<compile_context>
chip_gen: v5e
topology: v5e:2x2
jax: 0.10.0
libtpu: 0.0.40
codegen_flags: <defaults>
</compile_context>

<pallas_src>
import jax
import jax.numpy as jnp
from jax.experimental import pallas as pl
from jax.experimental.pallas import tpu as pltpu


def _chomp_copy_kernel(x_ref, o_ref):
    # Identical block shapes -> straight ref-to-ref copy (DMA in / DMA out).
    o_ref[...] = x_ref[...]


def chomp1d(x: jax.Array, chomp_size: int, *, min_pallas_bytes: int = 256 * 1024) -> jax.Array:
    """Pallas equivalent of Chomp1d.forward for (..., L) inputs (e.g. NCL)."""
    if chomp_size <= 0:
        return x

    *lead, L = x.shape
    L_out = L - chomp_size
    assert L_out > 0, "chomp_size must be smaller than the sequence length"

    rows = 1
    for d in lead:
        rows *= d

    itemsize = jnp.dtype(x.dtype).itemsize
    total_out_bytes = rows * L_out * itemsize

    # Small-size fast path: pallas_call launch + per-step overhead dominates for
    # tiny tensors; a plain XLA slice fuses into neighbours and is ~free.
    if total_out_bytes < min_pallas_bytes:
        return x[..., :L_out]

    # Flatten leading dims: contiguous, free reshape. Packs all rows onto the
    # sublane axis regardless of channel count / alignment.
    x2 = x.reshape(rows, L)

    # Sublane multiple depends on dtype packing (8 for f32, 16 for bf16, 32 for i8).
    sub_mult = 8 * max(1, 4 // itemsize)
    LANE = 128

    rows_pad = pl.cdiv(rows, sub_mult) * sub_mult
    lout_pad = pl.cdiv(L_out, LANE) * LANE

    # Block sizing driven by a byte budget (~2 MiB per block).  Pick the row
    # tile first (capped at 256 sublanes), then grow the lane tile until the
    # block hits the budget.  Small-row inputs therefore get long lane tiles
    # (4096+) instead of a fixed 1024 cap; bf16/int8 get proportionally wider
    # tiles so block *bytes* stay constant.
    TARGET_BLOCK_BYTES = 2 * 1024 * 1024
    R = min(rows_pad, 256)
    L_TILE = (TARGET_BLOCK_BYTES // (R * itemsize)) // LANE * LANE
    L_TILE = max(LANE, min(L_TILE, lout_pad))

    grid_r = pl.cdiv(rows, R)
    grid_l = pl.cdiv(L_out, L_TILE)

    # v7x megacore: guarantee >= 2 grid steps along a "parallel" axis for
    # non-trivial inputs so both TensorCores share the copy (they share HBM BW).
    if grid_r == 1 and grid_l == 1 and total_out_bytes > 512 * 1024:
        if lout_pad >= 2 * LANE:
            L_TILE = max(LANE, pl.cdiv(lout_pad // 2, LANE) * LANE)
        elif rows_pad >= 2 * sub_mult:
            R = max(sub_mult, pl.cdiv(rows_pad // 2, sub_mult) * sub_mult)
        grid_r = pl.cdiv(rows, R)
        grid_l = pl.cdiv(L_out, L_TILE)

    out2 = pl.pallas_call(
        _chomp_copy_kernel,
        out_shape=jax.ShapeDtypeStruct((rows, L_out), x.dtype),
        grid=(grid_r, grid_l),
        # Input blocks are indexed over L_out tiles with the SAME shape as the
        # output blocks; only the last lane tile may over-read into the chomped
        # tail / padding, and Pallas masks the corresponding output columns.
        in_specs=[pl.BlockSpec((R, L_TILE), lambda i, j: (i, j))],
        out_specs=pl.BlockSpec((R, L_TILE), lambda i, j: (i, j)),
        compiler_params=pltpu.CompilerParams(
            dimension_semantics=("parallel", "parallel"),
            vmem_limit_bytes=32 * 1024 * 1024,
        ),
        # Zero-FLOP, pure memory traffic: helps XLA overlap surrounding ops.
        cost_estimate=pl.CostEstimate(
            flops=0,
            transcendentals=0,
            bytes_accessed=2 * rows * L_out * itemsize,
        ),
    )(x2)

    return out2.reshape(*lead, L_out)


if __name__ == "__main__":
    key = jax.random.PRNGKey(0)

    # Small shapes consistent with the module (NCL input to a causal conv).
    N, C, L = 2, 4, 16
    chomp_size = 3  # Chomp1d(chomp_size) — no learned parameters

    x = jax.random.normal(key, (N, C, L), dtype=jnp.float32)
    ref = x[..., :-chomp_size]

    # Default path (tiny tensor -> XLA-slice fast path).
    out_fast = jax.block_until_ready(chomp1d(x, chomp_size))
    assert out_fast.shape == (N, C, L - chomp_size)
    assert jnp.array_equal(out_fast, ref)

    # Force the Pallas kernel on the same small input.
    out_pallas = jax.block_until_ready(chomp1d(x, chomp_size, min_pallas_bytes=0))
    assert out_pallas.shape == (N, C, L - chomp_size)
    assert jnp.array_equal(out_pallas, ref)

    # Identity path (chomp_size == 0).
    out0 = jax.block_until_ready(chomp1d(x, 0))
    assert jnp.array_equal(out0, x)

    # Non-aligned case: rows not a multiple of 8, L_out not a multiple of 128,
    # exercising padded reads + masked tail stores in the Pallas kernel.
    x2 = jax.random.normal(jax.random.PRNGKey(1), (2, 5, 200), dtype=jnp.float32)
    out2 = jax.block_until_ready(chomp1d(x2, 7, min_pallas_bytes=0))
    assert out2.shape == (2, 5, 193)
    assert jnp.array_equal(out2, x2[..., :-7])

    # Medium case: exercises the adaptive block sizing + v7x grid-split logic
    # (rows=8 f32, >512 KiB -> lane tiling split into >=2 parallel steps).
    x3 = jax.random.normal(jax.random.PRNGKey(2), (2, 4, 40000), dtype=jnp.float32)
    out3 = jax.block_until_ready(chomp1d(x3, 7))
    assert out3.shape == (2, 4, 39993)
    assert jnp.array_equal(out3, x3[..., :-7])

    print("KERNEL_OK")
</pallas_src>

<mosaic_0001>
module attributes {stable_mosaic.version = 11 : i64} {
  func.func @_chomp_copy_kernel(%arg0: i32, %arg1: i32, %arg2: memref<8x128xf32, #tpu.memory_space<vmem>>, %arg3: memref<8x128xf32, #tpu.memory_space<vmem>>) attributes {dimension_semantics = [#tpu.dimension_semantics<parallel>, #tpu.dimension_semantics<parallel>], iteration_bounds = array<i64: 1, 1>, scalar_prefetch = 0 : i64, scratch_operands = 0 : i64, tpu.core_type = #tpu.core_type<tc>, window_params = [{transform_indices = @transform_0, window_bounds = array<i64: 8, 128>}, {transform_indices = @transform_1, window_bounds = array<i64: 8, 128>}]} {
    %c0 = arith.constant 0 : index
    %c0_0 = arith.constant 0 : index
    %0 = vector.load %arg2[%c0, %c0_0] : memref<8x128xf32, #tpu.memory_space<vmem>>, vector<8x128xf32>
    %c0_1 = arith.constant 0 : index
    %c0_2 = arith.constant 0 : index
    %1 = vector.load %arg3[%c0_1, %c0_2] : memref<8x128xf32, #tpu.memory_space<vmem>>, vector<8x128xf32>
    tpu.vector_store %arg3[%c0_1, %c0_2], %0 {strides = array<i32>} : memref<8x128xf32, #tpu.memory_space<vmem>>, vector<8x128xf32>,
    return
  }
  func.func @transform_0(%arg0: i32, %arg1: i32) -> (i32, i32) {
    %c0_i32 = arith.constant 0 : i32
    return %arg0, %arg1 : i32, i32
  }
  func.func @transform_1(%arg0: i32, %arg1: i32) -> (i32, i32) {
    %c0_i32 = arith.constant 0 : i32
    return %arg0, %arg1 : i32, i32
  }
}

</mosaic_0001>

<bundles_post_ra>
// kernel: tpu_custom_call.1
= control target key start
LH: loop header
LB: loop body
LE: loop exit
PB: predicated region body
PF: predicated region fallthrough
CT: control target
= control target key end

     0   :  { %6 = vsyncpa [#allocation3], 0  ;;  %s114_s0 = inlined_call_operand.hbm [shape: f32[8,16], index: 0, kind: input, shape index: {}]   ;;  %s115_s1 = inlined_call_operand.hbm [shape: f32[8,13], index: 1, kind: output, shape index: {}]  }
   0x1   :  { %7 = vsyncpa [#allocation4], 0  ;;  %s13_s8 = sshll.u32 %s114_s0, 4  ;;  %s96_s9 = smov [#allocation2]   ;;  %s14_s8 = int_to_ptr.hbm [resolvable:$true] %s13_s8 }
   0x2   :  { %s15_s10 = sshll.u32 %s96_s9, 4  ;;  %s16_s10 = int_to_ptr.vmem [resolvable:$true] %s15_s10 }
   0x3   :  { %18 = dma.hbm_to_vmem [thread:$0]  %s14_s8, 128, %s16_s10, [#allocation3]  }
   0x4   :  { %92 = dma.done.wait [#allocation3], 128  }
   0x5   :  { %93 = vsyncadd [#allocation3], 4294967168  ;;  %s97_s11 = smov [#allocation5]   ;;  %s32_s15 = sshll.u32 %s115_s1, 4  ;;  %v23_v0 = vld [vmem:[#allocation2] sm:$0xff]  ;;  %s33_s15 = int_to_ptr.hbm [resolvable:$true] %s32_s15 }
   0x6   :  { %s30_s12 = sshll.u32 %s97_s11, 4  ;;  %24 = vst [vmem:[#allocation5] sm:$0xff] %v23_v0  ;;  %s31_s12 = int_to_ptr.vmem [resolvable:$true] %s30_s12 }
   0x7   :  { %35 = dma.vmem_to_hbm [thread:$0]  %s31_s12, 128, %s33_s15, [#allocation4]  }
   0x8   :  { %94 = dma.done.wait [#allocation4], 128  }
   0x9   :  { %95 = vsyncadd [#allocation4], 4294967168 }
   0xa   :  { %40 = vsyncpa [#allocation3], 1 }
   0xb   :  { %41 = vsyncpa [#allocation4], 1 }

</bundles_post_ra>
